<compile_context>
chip_gen: v5e
topology: v5e:2x2
jax: 0.10.0
libtpu: 0.0.40
codegen_flags: <defaults>
</compile_context>

<pallas_src>
import jax
import jax.numpy as jnp
from jax.experimental import pallas as pl
from jax.experimental.pallas import tpu as pltpu

# ----------------------------- problem sizes ---------------------------------
B = 2            # batch
N = 8            # set size (elements per set)
D_IN = 16        # inpt_dim
HID = 32         # hidden width of every MLP
D_FEAT = 32      # feat_net output dim (== head_dim, since n_heads == 1)
D_OUT = 8        # outp_dim
D_OUT_PAD = 128  # lane-dense output slab; sliced back to D_OUT outside
LRELU_SLOPE = 0.1
NEG_BIG = 1e30


def _lrelu(x):
    return jnp.where(x > 0, x, LRELU_SLOPE * x)


# ------------------------------- kernel --------------------------------------
def deepset_kernel(
    x_ref,      # (B*N, D_IN)        flattened set elements
    m_ref,      # (B, N, 1)          float {0,1} mask
    w1_ref,     # (D_IN, 2*HID)      fused feat|attn layer-1 weight
    b1_ref,     # (1, 2*HID)
    w2_ref,     # (2*HID, D_FEAT+1)  block-diag fused layer-2 weight
    b2_ref,     # (1, D_FEAT+1)
    w1p_ref,    # (D_FEAT, HID)      post_net layer 1
    b1p_ref,    # (1, HID)
    w2p_ref,    # (HID, D_OUT_PAD)   post_net layer 2, lane-padded
    b2p_ref,    # (1, D_OUT_PAD)
    out_ref,    # (B, D_OUT_PAD)
):
    x = x_ref[...]
    m = m_ref[...]

    # ---- fused feat_net + attn_net, layer 1 (one MXU pass over all B*N rows)
    h = jnp.dot(x, w1_ref[...], preferred_element_type=jnp.float32) + b1_ref[...]
    h = _lrelu(h)                                                # (B*N, 2*HID)

    # ---- fused layer 2 (block diagonal) -> [feat | attn_logit] in one pass
    fused = jnp.dot(h, w2_ref[...], preferred_element_type=jnp.float32) + b2_ref[...]
    feat = fused[:, :D_FEAT].reshape(B, N, D_FEAT)               # (B, N, D_FEAT)
    logit = fused[:, D_FEAT:D_FEAT + 1].reshape(B, N, 1)         # (B, N, 1)

    # ---- masked softmax over the set axis (additive mask bias, no inf math)
    logit = logit + (m - 1.0) * NEG_BIG
    amax = jnp.max(logit, axis=1, keepdims=True)                 # (B, 1, 1)
    e = jnp.exp(logit - amax)
    denom = jnp.sum(e, axis=1, keepdims=True)                    # (B, 1, 1)
    inv = pl.reciprocal(denom, approx=True)                      # EUP slot
    inv = inv * (2.0 - denom * inv)                              # 1 Newton step -> ~f32 exact
    # trailing "* m" reproduces nan_to_num(softmax, 0) for fully-masked sets
    attn = e * inv * m                                           # (B, N, 1)

    # ---- n_heads == 1: attention weight broadcasts over all D_FEAT features
    pooled = jnp.sum(feat * attn, axis=1)                        # (B, D_FEAT)

    # ---- post_net; final matmul writes a lane-dense (B, 128) slab
    hp = jnp.dot(pooled, w1p_ref[...], preferred_element_type=jnp.float32) + b1p_ref[...]
    hp = _lrelu(hp)
    out_ref[...] = jnp.dot(hp, w2p_ref[...], preferred_element_type=jnp.float32) + b2p_ref[...]


# ------------------------------- wrapper --------------------------------------
def deepset_forward(x, mask_f, params):
    """x: (B, N, D_IN) f32, mask_f: (B, N, 1) f32 in {0,1}."""
    (w1f, b1f, w2f, b2f) = params["feat"]
    (w1a, b1a, w2a, b2a) = params["attn"]
    (w1p, b1p, w2p, b2p) = params["post"]

    # Fuse feat_net & attn_net: shared layer-1, block-diagonal layer-2.
    w1 = jnp.concatenate([w1f, w1a], axis=1)                     # (D_IN, 2*HID)
    b1 = jnp.concatenate([b1f, b1a], axis=1)                     # (1, 2*HID)
    w2 = jnp.zeros((2 * HID, D_FEAT + 1), jnp.float32)
    w2 = w2.at[:HID, :D_FEAT].set(w2f).at[HID:, D_FEAT:].set(w2a)
    b2 = jnp.concatenate([b2f, b2a], axis=1)                     # (1, D_FEAT+1)

    # Lane-dense output: pad post layer-2 to 128 output lanes (zeros), slice after.
    w2p_pad = jnp.zeros((HID, D_OUT_PAD), jnp.float32).at[:, :D_OUT].set(w2p)
    b2p_pad = jnp.zeros((1, D_OUT_PAD), jnp.float32).at[:, :D_OUT].set(b2p)

    x_flat = x.reshape(B * N, D_IN)

    vmem = pl.BlockSpec(memory_space=pltpu.MemorySpace.VMEM)
    out = pl.pallas_call(
        deepset_kernel,
        out_shape=jax.ShapeDtypeStruct((B, D_OUT_PAD), jnp.float32),
        in_specs=[vmem] * 10,
        out_specs=vmem,
    )(x_flat, mask_f, w1, b1, w2, b2, w1p, b1p, w2p_pad, b2p_pad)

    return out[:, :D_OUT]


# --------------------------- pure-JAX reference --------------------------------
def _mlp_ref(x, w1, b1, w2, b2):
    h = _lrelu(x @ w1 + b1)
    return h @ w2 + b2


def deepset_ref(x, mask_bool, params):
    feat = _mlp_ref(x, *params["feat"])                 # (B, N, D_FEAT)
    attn = _mlp_ref(x, *params["attn"])                 # (B, N, 1)
    attn = jnp.where(mask_bool[..., None], attn, -jnp.inf)
    attn = jax.nn.softmax(attn, axis=-2)
    attn = jnp.nan_to_num(attn, nan=0.0)
    pooled = jnp.sum(feat * attn, axis=-2)              # (B, D_FEAT)
    return _mlp_ref(pooled, *params["post"])            # (B, D_OUT)


# ------------------------------ param init ------------------------------------
def init_params(key):
    def lin(key, din, dout):
        kw, kb = jax.random.split(key)
        scale = 1.0 / jnp.sqrt(jnp.float32(din))
        w = jax.random.uniform(kw, (din, dout), jnp.float32, -scale, scale)
        b = jax.random.uniform(kb, (1, dout), jnp.float32, -scale, scale)
        return w, b

    keys = jax.random.split(key, 6)
    w1f, b1f = lin(keys[0], D_IN, HID)
    w2f, b2f = lin(keys[1], HID, D_FEAT)
    w1a, b1a = lin(keys[2], D_IN, HID)
    w2a, b2a = lin(keys[3], HID, 1)          # attn_net outp_dim defaults to 1
    w1p, b1p = lin(keys[4], D_FEAT, HID)
    w2p, b2p = lin(keys[5], HID, D_OUT)
    return {
        "feat": (w1f, b1f, w2f, b2f),
        "attn": (w1a, b1a, w2a, b2a),
        "post": (w1p, b1p, w2p, b2p),
    }


# --------------------------------- main ----------------------------------------
if __name__ == "__main__":
    key = jax.random.PRNGKey(0)
    k_x, k_p = jax.random.split(key)

    x = jax.random.normal(k_x, (B, N, D_IN), jnp.float32)
    # variable-length sets: batch 0 uses all 8 elements, batch 1 only the first 5
    lengths = jnp.array([8, 5], dtype=jnp.int32)
    mask_bool = jnp.arange(N)[None, :] < lengths[:, None]           # (B, N) bool
    mask_f = mask_bool.astype(jnp.float32)[..., None]               # (B, N, 1)

    params = init_params(k_p)

    out = deepset_forward(x, mask_f, params)
    out = jax.block_until_ready(out)

    ref = deepset_ref(x, mask_bool, params)
    assert out.shape == (B, D_OUT)
    # 5e-4 tolerance: the only deliberate numeric delta vs. the reference is the
    # EUP approx-reciprocal (+1 Newton step) softmax normalization.
    assert jnp.allclose(out, ref, rtol=5e-4, atol=5e-4), (out, ref)

    print("KERNEL_OK")
</pallas_src>

<mosaic_0001>
module attributes {stable_mosaic.version = 11 : i64} {
  func.func @deepset_kernel(%arg0: memref<16x16xf32, #tpu.memory_space<vmem>>, %arg1: memref<2x8x1xf32, #tpu.memory_space<vmem>>, %arg2: memref<16x64xf32, #tpu.memory_space<vmem>>, %arg3: memref<1x64xf32, #tpu.memory_space<vmem>>, %arg4: memref<64x33xf32, #tpu.memory_space<vmem>>, %arg5: memref<1x33xf32, #tpu.memory_space<vmem>>, %arg6: memref<32x32xf32, #tpu.memory_space<vmem>>, %arg7: memref<1x32xf32, #tpu.memory_space<vmem>>, %arg8: memref<32x128xf32, #tpu.memory_space<vmem>>, %arg9: memref<1x128xf32, #tpu.memory_space<vmem>>, %arg10: memref<2x128xf32, #tpu.memory_space<vmem>>) attributes {dimension_semantics = [], scalar_prefetch = 0 : i64, scratch_operands = 0 : i64, tpu.core_type = #tpu.core_type<tc>} {
    %c0 = arith.constant 0 : index
    %c0_0 = arith.constant 0 : index
    %0 = vector.load %arg0[%c0, %c0_0] : memref<16x16xf32, #tpu.memory_space<vmem>>, vector<16x16xf32>
    %c0_1 = arith.constant 0 : index
    %c0_2 = arith.constant 0 : index
    %c0_3 = arith.constant 0 : index
    %1 = vector.load %arg1[%c0_1, %c0_2, %c0_3] : memref<2x8x1xf32, #tpu.memory_space<vmem>>, vector<2x8x1xf32>
    %c0_4 = arith.constant 0 : index
    %c0_5 = arith.constant 0 : index
    %2 = vector.load %arg2[%c0_4, %c0_5] : memref<16x64xf32, #tpu.memory_space<vmem>>, vector<16x64xf32>
    %cst = arith.constant dense<0.000000e+00> : vector<16x64xf32>
    %3 = tpu.matmul %0, %2, %cst {dimension_numbers = #tpu.dot_dimension_numbers<[1], [0], [0], [1], [0, 0, 1, 1], [], []>} : vector<16x16xf32>, vector<16x64xf32>, vector<16x64xf32> -> vector<16x64xf32>
    %c0_6 = arith.constant 0 : index
    %c0_7 = arith.constant 0 : index
    %4 = vector.load %arg3[%c0_6, %c0_7] : memref<1x64xf32, #tpu.memory_space<vmem>>, vector<1x64xf32>
    %5 = vector.broadcast %4 : vector<1x64xf32> to vector<16x64xf32>
    %6 = arith.addf %3, %5 : vector<16x64xf32>
    %cst_8 = arith.constant 0.000000e+00 : f32
    %7 = vector.broadcast %cst_8 : f32 to vector<16x64xf32>
    %8 = arith.cmpf ogt, %6, %7 : vector<16x64xf32>
    %cst_9 = arith.constant 1.000000e-01 : f32
    %9 = vector.broadcast %cst_9 : f32 to vector<16x64xf32>
    %10 = arith.mulf %9, %6 : vector<16x64xf32>
    %11 = arith.select %8, %6, %10 : vector<16x64xi1>, vector<16x64xf32>
    %c0_10 = arith.constant 0 : index
    %c0_11 = arith.constant 0 : index
    %12 = vector.load %arg4[%c0_10, %c0_11] : memref<64x33xf32, #tpu.memory_space<vmem>>, vector<64x33xf32>
    %cst_12 = arith.constant dense<0.000000e+00> : vector<16x33xf32>
    %13 = tpu.matmul %11, %12, %cst_12 {dimension_numbers = #tpu.dot_dimension_numbers<[1], [0], [0], [1], [0, 0, 1, 1], [], []>} : vector<16x64xf32>, vector<64x33xf32>, vector<16x33xf32> -> vector<16x33xf32>
    %c0_13 = arith.constant 0 : index
    %c0_14 = arith.constant 0 : index
    %14 = vector.load %arg5[%c0_13, %c0_14] : memref<1x33xf32, #tpu.memory_space<vmem>>, vector<1x33xf32>
    %15 = vector.broadcast %14 : vector<1x33xf32> to vector<16x33xf32>
    %16 = arith.addf %13, %15 : vector<16x33xf32>
    %17 = vector.extract_strided_slice %16 {offsets = [0, 0], sizes = [16, 32], strides = [1, 1]} : vector<16x33xf32> to vector<16x32xf32>
    %18 = vector.shape_cast %17 : vector<16x32xf32> to vector<2x8x32xf32>
    %19 = vector.extract_strided_slice %16 {offsets = [0, 32], sizes = [16, 1], strides = [1, 1]} : vector<16x33xf32> to vector<16x1xf32>
    %20 = vector.shape_cast %19 : vector<16x1xf32> to vector<2x8x1xf32>
    %cst_15 = arith.constant 1.000000e+00 : f32
    %21 = vector.broadcast %cst_15 : f32 to vector<2x8x1xf32>
    %22 = arith.subf %1, %21 : vector<2x8x1xf32>
    %cst_16 = arith.constant 1.000000e+30 : f32
    %23 = vector.broadcast %cst_16 : f32 to vector<2x8x1xf32>
    %24 = arith.mulf %22, %23 : vector<2x8x1xf32>
    %25 = arith.addf %20, %24 : vector<2x8x1xf32>
    %cst_17 = arith.constant dense<0xFF800000> : vector<2x1xf32>
    %26 = vector.multi_reduction <maximumf>, %25, %cst_17 [1] : vector<2x8x1xf32> to vector<2x1xf32>
    %27 = vector.shape_cast %26 : vector<2x1xf32> to vector<2x1x1xf32>
    %28 = vector.broadcast %27 : vector<2x1x1xf32> to vector<2x8x1xf32>
    %29 = arith.subf %25, %28 : vector<2x8x1xf32>
    %30 = math.exp %29 : vector<2x8x1xf32>
    %cst_18 = arith.constant dense<0.000000e+00> : vector<2x1xf32>
    %31 = vector.multi_reduction <add>, %30, %cst_18 [1] : vector<2x8x1xf32> to vector<2x1xf32>
    %32 = vector.shape_cast %31 : vector<2x1xf32> to vector<2x1x1xf32>
    %33 = tpu.reciprocal %32 {approx = true} : vector<2x1x1xf32> -> vector<2x1x1xf32>
    %34 = arith.mulf %32, %33 : vector<2x1x1xf32>
    %cst_19 = arith.constant 2.000000e+00 : f32
    %35 = vector.broadcast %cst_19 : f32 to vector<2x1x1xf32>
    %36 = arith.subf %35, %34 : vector<2x1x1xf32>
    %37 = arith.mulf %33, %36 : vector<2x1x1xf32>
    %38 = vector.broadcast %37 : vector<2x1x1xf32> to vector<2x8x1xf32>
    %39 = arith.mulf %30, %38 : vector<2x8x1xf32>
    %40 = arith.mulf %39, %1 : vector<2x8x1xf32>
    %41 = vector.broadcast %40 : vector<2x8x1xf32> to vector<2x8x32xf32>
    %42 = arith.mulf %18, %41 : vector<2x8x32xf32>
    %cst_20 = arith.constant dense<0.000000e+00> : vector<2x32xf32>
    %43 = vector.multi_reduction <add>, %42, %cst_20 [1] : vector<2x8x32xf32> to vector<2x32xf32>
    %c0_21 = arith.constant 0 : index
    %c0_22 = arith.constant 0 : index
    %44 = vector.load %arg6[%c0_21, %c0_22] : memref<32x32xf32, #tpu.memory_space<vmem>>, vector<32x32xf32>
    %cst_23 = arith.constant dense<0.000000e+00> : vector<2x32xf32>
    %45 = tpu.matmul %43, %44, %cst_23 {dimension_numbers = #tpu.dot_dimension_numbers<[1], [0], [0], [1], [0, 0, 1, 1], [], []>} : vector<2x32xf32>, vector<32x32xf32>, vector<2x32xf32> -> vector<2x32xf32>
    %c0_24 = arith.constant 0 : index
    %c0_25 = arith.constant 0 : index
    %46 = vector.load %arg7[%c0_24, %c0_25] : memref<1x32xf32, #tpu.memory_space<vmem>>, vector<1x32xf32>
    %47 = vector.broadcast %46 : vector<1x32xf32> to vector<2x32xf32>
    %48 = arith.addf %45, %47 : vector<2x32xf32>
    %cst_26 = arith.constant 0.000000e+00 : f32
    %49 = vector.broadcast %cst_26 : f32 to vector<2x32xf32>
    %50 = arith.cmpf ogt, %48, %49 : vector<2x32xf32>
    %cst_27 = arith.constant 1.000000e-01 : f32
    %51 = vector.broadcast %cst_27 : f32 to vector<2x32xf32>
    %52 = arith.mulf %51, %48 : vector<2x32xf32>
    %53 = arith.select %50, %48, %52 : vector<2x32xi1>, vector<2x32xf32>
    %c0_28 = arith.constant 0 : index
    %c0_29 = arith.constant 0 : index
    %54 = vector.load %arg8[%c0_28, %c0_29] : memref<32x128xf32, #tpu.memory_space<vmem>>, vector<32x128xf32>
    %cst_30 = arith.constant dense<0.000000e+00> : vector<2x128xf32>
    %55 = tpu.matmul %53, %54, %cst_30 {dimension_numbers = #tpu.dot_dimension_numbers<[1], [0], [0], [1], [0, 0, 1, 1], [], []>} : vector<2x32xf32>, vector<32x128xf32>, vector<2x128xf32> -> vector<2x128xf32>
    %c0_31 = arith.constant 0 : index
    %c0_32 = arith.constant 0 : index
    %56 = vector.load %arg9[%c0_31, %c0_32] : memref<1x128xf32, #tpu.memory_space<vmem>>, vector<1x128xf32>
    %57 = vector.broadcast %56 : vector<1x128xf32> to vector<2x128xf32>
    %58 = arith.addf %55, %57 : vector<2x128xf32>
    %c0_33 = arith.constant 0 : index
    %c0_34 = arith.constant 0 : index
    %59 = vector.load %arg10[%c0_33, %c0_34] : memref<2x128xf32, #tpu.memory_space<vmem>>, vector<2x128xf32>
    tpu.vector_store %arg10[%c0_33, %c0_34], %58 {strides = array<i32>} : memref<2x128xf32, #tpu.memory_space<vmem>>, vector<2x128xf32>,
    return
  }
}

</mosaic_0001>

<bundles_post_ra>
// kernel: tpu_custom_call.1
= control target key start
LH: loop header
LB: loop body
LE: loop exit
PB: predicated region body
PF: predicated region fallthrough
CT: control target
= control target key end

     0   :  { %vm46_vm0 = vcmask 130048   ;;  %s511_s0 = inlined_call_operand.vmem [shape: f32[16,16], index: 0, kind: input, shape index: {}]   ;;  %s512_s1 = inlined_call_operand.vmem [shape: f32[2,8,1], index: 1, kind: input, shape index: {}]   ;;  %s513_s2 = inlined_call_operand.vmem [shape: f32[16,64], index: 2, kind: input, shape index: {}]   ;;  %s514_s3 = inlined_call_operand.vmem [shape: f32[1,64], index: 3, kind: input, shape index: {}]   ;;  %s515_s4 = inlined_call_operand.vmem [shape: f32[64,33], index: 4, kind: input, shape index: {}]   ;;  %s516_s5 = inlined_call_operand.vmem [shape: f32[1,33], index: 5, kind: input, shape index: {}]   ;;  %s517_s6 = inlined_call_operand.vmem [shape: f32[32,32], index: 6, kind: input, shape index: {}]   ;;  %s518_s7 = inlined_call_operand.vmem [shape: f32[1,32], index: 7, kind: input, shape index: {}]   ;;  %s519_s8 = inlined_call_operand.vmem [shape: f32[32,128], index: 8, kind: input, shape index: {}]   ;;  %s520_s9 = inlined_call_operand.vmem [shape: f32[1,128], index: 9, kind: input, shape index: {}]   ;;  %s521_s10 = inlined_call_operand.hbm [shape: f32[2,128], index: 10, kind: output, shape index: {}]  }
   0x1   :  { %v41_v0 = vld [vmem:[%s513_s2 + $0x8] sm:$0xff]  ;;  %v40_v1 = vld [vmem:[%s513_s2] sm:$0xff]  ;;  %v89_v3 = vld [vmem:[%s515_s4 + $0x38] sm:$0xff] }
   0x2   :  { %67 = vmatpush.msra.mxu0 %v41_v0  ;;  %v36_v2 = vld [vmem:[%s511_s0] sm:$0xff]  ;;  %v88_v4 = vld [vmem:[%s515_s4 + $0x30] sm:$0xff]  ;;  %109 = vmatpush.msra.mxu1 %v89_v3  ;;  %v87_v5 = vld [vmem:[%s515_s4 + $0x28] sm:$0xff] }
   0x4   :  { %68 = vmatpush.msra.mxu0 %v40_v1  ;;  %110 = vmatpush.msra.mxu1 %v88_v4 }
   0x5   :  { %305 = vmatmul.msk.f32.vlgmr.msra.gmra.mxu0 %vm46_vm0, %v36_v2 }
   0x6   :  { %15 = vsyncpa [#allocation3], 0  ;;  %v86_v6 = vld [vmem:[%s515_s4 + $0x20] sm:$0xff]  ;;  %111 = vmatpush.msra.mxu1 %v87_v5  ;;  %v85_v7 = vld [vmem:[%s515_s4 + $0x18] sm:$0xff]  ;;  %vm94_vm2 = vcmask 523264   ;;  %vm138_vm4 = vcmask 269568  }
   0x7   :  { %v37_v8 = vld [vmem:[%s511_s0 + $0x8] sm:$0xff]  ;;  %v84_v9 = vld [vmem:[%s515_s4 + $0x10] sm:$0xff]  ;;  %v82_v11 = vld [vmem:[%s515_s4] sm:$0xff]  ;;  %s356_s0 = smov 32   ;;  %v357_v53 = vmov 32   ;;  %vm205_vm5 = vcmask 261120  }
   0x8   :  { %112 = vmatpush.msra.mxu1 %v86_v6  ;;  %v83_v10 = vld [vmem:[%s515_s4 + $0x8] sm:$0xff]  ;;  %v38_v12 = vld [vmem:[%s512_s1] sm:$0xff]  ;;  %316 = vset.pattern.permute.xlu2 %v357_v53  ;;  %vm230_vm6 = vcmask 1041409   ;;  %s296_s20 = sshll.u32 %s521_s10, 4  ;;  %s297_s20 = int_to_ptr.hbm [resolvable:$true] %s296_s20 }
   0x9   :  { %v309_v13 = vadd.f32 -1.0, %v38_v12  ;;  %185 = vrot.lane.b32.xlu1 %v38_v12, %s356_s0  ;;  %v39_v14 = vld [vmem:[%s512_s1 + $0x8] sm:$0xff]  ;;  %v318_v18 = vld [vmem:[%s514_s3] ss:$0 sm:$0xff]  ;;  %317 = vset.pattern.permute.xlu0 %v357_v53 }
   0xa   :  { %113 = vmatpush.msra.mxu1 %v85_v7  ;;  %v310_v16 = vadd.f32 -1.0, %v39_v14  ;;  %v319_v27 = vld [vmem:[%s516_s5] ss:$0 sm:$0xff] }
   0xb   :  { %v126_v15 = vmul.f32 1e+30, %v309_v13  ;;  %v321_v53 = vld [vmem:[%s520_s9] ss:$0 sm:$0xff] }
   0xc   :  { %114 = vmatpush.msra.mxu1 %v84_v9  ;;  %v127_v17 = vmul.f32 1e+30, %v310_v16 }
   0xd   :  { %306 = vmatmul.msk.f32.gmra.mxu0 %vm46_vm0, %v37_v8  ;;  %130 = vrot.lane.b32.xlu0 %v126_v15, %s356_s0 }
   0xe   :  { %115 = vmatpush.msra.mxu1 %v83_v10 }
  0x10   :  { %116 = vmatpush.msra.mxu1 %v82_v11 }
  0x11   :  { %187 = vrot.lane.b32.xlu1 %v39_v14, %s356_s0 }
  0x15   :  { %132 = vrot.lane.b32.xlu0 %v127_v17, %s356_s0  ;;  %s358_s0 = smov [#allocation2]  }
  0x16   :  { %s294_s18 = sshll.u32 %s358_s0, 4  ;;  %s295_s18 = int_to_ptr.vmem [resolvable:$true] %s294_s18 }
  0x7b   :  { %v186_v10 = vpop.permute.xlu1 %185 }
  0x7f   :  { %v131_v28 = vpop.permute.xlu0 %130 }
  0x82   :  { %v70_v19 = vpop.f32.mrf.mxu0 }
  0x83   :  { %v71_v20 = vadd.f32 %v318_v18, %v70_v19 }
  0x85   :  { %v78_v21 = vmul.f32 0.1, %v71_v20  ;;  %vm76_vm1 = vcmp.gt.f32.partialorder %v71_v20, 0.0 }
  0x87   :  { %v80_v22 = vsel %vm76_vm1, %v71_v20, %v78_v21  ;;  %v133_v36 = vpop.permute.xlu0 %132  ;;  %v223_v21 = vld [vmem:[%s517_s6 + $0x18] sm:$0xff] }
  0x88   :  { %307 = vmatmul.msk.f32.vlgmr.msra.gmra.mxu1 %vm94_vm2, %v80_v22  ;;  %246 = vmatpush.msra.mxu2 %v223_v21  ;;  %v222_v22 = vld [vmem:[%s517_s6 + $0x10] sm:$0xff] }
  0x8a   :  { %v73_v23 = vpop.f32.mrf.mxu0  ;;  %247 = vmatpush.msra.mxu2 %v222_v22 }
  0x8b   :  { %v74_v24 = vadd.f32 %v318_v18, %v73_v23  ;;  %v188_v18 = vpop.permute.xlu1 %187  ;;  %v221_v23 = vld [vmem:[%s517_s6 + $0x8] sm:$0xff] }
  0x8c   :  { %248 = vmatpush.msra.mxu2 %v221_v23 }
  0x8d   :  { %v79_v25 = vmul.f32 0.1, %v74_v24  ;;  %vm77_vm3 = vcmp.gt.f32.partialorder %v74_v24, 0.0 }
  0x8f   :  { %v81_v26 = vsel %vm77_vm3, %v74_v24, %v79_v25  ;;  %v220_v24 = vld [vmem:[%s517_s6] sm:$0xff]  ;;  %v260_v25 = vld [vmem:[%s519_s8 + $0x18] sm:$0xff] }
  0x90   :  { %308 = vmatmul.msk.f32.gmra.mxu1 %vm94_vm2, %v81_v26  ;;  %249 = vmatpush.msra.mxu2 %v220_v24 }
  0x91   :  { %280 = vmatpush.msra.mxu3 %v260_v25 }
 0x105   :  { %v118_v29 = vpop.f32.mrf.mxu1 }
 0x106   :  { %v462_v30 = vadd.f32 %v319_v27, %v118_v29 }
 0x108   :  { %v136_v31 = vadd.f32 %v131_v28, %v462_v30 }
 0x10a   :  { %v139_v32 = vsel %vm138_vm4, %v136_v31, -inf }
 0x10b   :  { %v140_v33 = vrot.slane %v139_v32, 4 }
 0x10d   :  { %v141_v34 = vmax.f32 %v139_v32, %v140_v33  ;;  %v121_v35 = vpop.f32.mrf.mxu1 }
 0x10e   :  { %v466_v37 = vadd.f32 %v319_v27, %v121_v35 }
 0x10f   :  { %v142_v38 = vrot.slane %v141_v34, 2 }
 0x110   :  { %v137_v39 = vadd.f32 %v133_v36, %v466_v37 }
 0x111   :  { %v143_v40 = vmax.f32 %v141_v34, %v142_v38 }
 0x112   :  { %v146_v41 = vsel %vm138_vm4, %v137_v39, -inf }
 0x113   :  { %v144_v42 = vrot.slane %v143_v40, 1  ;;  %v147_v43 = vrot.slane %v146_v41, 4 }
 0x115   :  { %v145_v44 = vmax.f32 %v143_v40, %v144_v42  ;;  %v148_v45 = vmax.f32 %v146_v41, %v147_v43 }
 0x117   :  { %v153_v46 = vsub.f32 %v136_v31, %v145_v44  ;;  %v149_v47 = vrot.slane %v148_v45, 2 }
 0x119   :  { %v155_v48 = vmul.f32 1.442695, %v153_v46  ;;  %v150_v49 = vmax.f32 %v148_v45, %v149_v47  ;;  %v258_v46 = vld [vmem:[%s519_s8 + $0x8] sm:$0xff]  ;;  %v257_v47 = vld [vmem:[%s519_s8] sm:$0xff] }
 0x11b   :  { %322 = vpow2.f32 %v155_v48  ;;  %v151_v50 = vrot.slane %v150_v49, 1  ;;  %v320_v48 = vld [vmem:[%s518_s7] ss:$0 sm:$0xff] }
 0x11d   :  { %v152_v51 = vmax.f32 %v150_v49, %v151_v50 }
 0x11f   :  { %v154_v52 = vsub.f32 %v137_v39, %v152_v51 }
 0x121   :  { %v323_v54 = vpop.eup %322  ;;  %v157_v55 = vmul.f32 1.442695, %v154_v52 }
 0x122   :  { %v159_v56 = vsel %vm138_vm4, %v323_v54, 0.0 }
 0x123   :  { %v160_v57 = vrot.slane %v159_v56, 4  ;;  %324 = vpow2.f32 %v157_v55 }
 0x125   :  { %v161_v58 = vadd.f32 %v160_v57, %v159_v56 }
 0x127   :  { %v162_v59 = vrot.slane %v161_v58, 2 }
 0x129   :  { %v325_v60 = vpop.eup %324  ;;  %v163_v61 = vadd.f32 %v162_v59, %v161_v58 }
 0x12a   :  { %v166_v62 = vsel %vm138_vm4, %v325_v60, 0.0 }
 0x12b   :  { %v167_v63 = vrot.slane %v166_v62, 4  ;;  %v164_v0 = vrot.slane %v163_v61, 1 }
 0x12d   :  { %v168_v1 = vadd.f32 %v167_v63, %v166_v62  ;;  %v165_v2 = vadd.f32 %v164_v0, %v163_v61 }
 0x12f   :  { %326 = vrcp.f32 %v165_v2  ;;  %v169_v3 = vrot.slane %v168_v1, 2 }
 0x131   :  { %v170_v4 = vadd.f32 %v169_v3, %v168_v1 }
 0x133   :  { %v171_v5 = vrot.slane %v170_v4, 1 }
 0x135   :  { %v327_v6 = vpop.eup %326  ;;  %v172_v7 = vadd.f32 %v171_v5, %v170_v4 }
 0x136   :  { %v175_v8 = vmul.f32 %v327_v6, %v165_v2 }
 0x137   :  { %328 = vrcp.f32 %v172_v7 }
 0x138   :  { %v177_v9 = vsub.f32 2.0, %v175_v8 }
 0x13a   :  { %v179_v11 = vmul.f32 %v327_v6, %v177_v9 }
 0x13c   :  { %v181_v12 = vmul.f32 %v323_v54, %v179_v11 }
 0x13d   :  { %v329_v13 = vpop.eup %328 }
 0x13e   :  { %v191_v14 = vmul.f32 %v186_v10, %v181_v12  ;;  %v176_v15 = vmul.f32 %v329_v13, %v172_v7 }
 0x140   :  { %195 = vperm.xlu2 %316, %v191_v14   ;;  %v178_v16 = vsub.f32 2.0, %v176_v15 }
 0x142   :  { %v180_v17 = vmul.f32 %v329_v13, %v178_v16 }
 0x144   :  { %v182_v19 = vmul.f32 %v325_v60, %v180_v17 }
 0x146   :  { %v192_v20 = vmul.f32 %v188_v18, %v182_v19 }
 0x148   :  { %200 = vperm.xlu2 %316, %v192_v20  }
 0x19a   :  { %v196_v26 = vpop.permute.xlu2 %195 }
 0x19b   :  { %v203_v27 = vmul.f32 %v196_v26, %v462_v30 }
 0x19d   :  { %v206_v28 = vsel %vm205_vm5, %v203_v27, 0.0 }
 0x19e   :  { %v207_v29 = vrot.slane %v206_v28, 4 }
 0x1a0   :  { %v208_v31 = vadd.f32 %v207_v29, %v206_v28 }
 0x1a2   :  { %v201_v32 = vpop.permute.xlu2 %200  ;;  %v209_v34 = vrot.slane %v208_v31, 2 }
 0x1a3   :  { %v204_v33 = vmul.f32 %v201_v32, %v466_v37  ;;  %v259_v37 = vld [vmem:[%s519_s8 + $0x10] sm:$0xff] }
 0x1a4   :  { %v210_v38 = vadd.f32 %v209_v34, %v208_v31  ;;  %281 = vmatpush.msra.mxu3 %v259_v37 }
 0x1a5   :  { %v213_v35 = vsel %vm205_vm5, %v204_v33, 0.0 }
 0x1a6   :  { %v214_v36 = vrot.slane %v213_v35, 4  ;;  %v211_v41 = vrot.slane %v210_v38, 1  ;;  %282 = vmatpush.msra.mxu3 %v258_v46 }
 0x1a8   :  { %v215_v39 = vadd.f32 %v214_v36, %v213_v35  ;;  %v212_v44 = vadd.f32 %v211_v41, %v210_v38  ;;  %283 = vmatpush.msra.mxu3 %v257_v47 }
 0x1aa   :  { %v216_v40 = vrot.slane %v215_v39, 2 }
 0x1ac   :  { %v217_v42 = vadd.f32 %v216_v40, %v215_v39 }
 0x1ae   :  { %v218_v43 = vrot.slane %v217_v42, 1 }
 0x1b0   :  { %v219_v30 = vadd.f32 %v218_v43, %v217_v42 }
 0x1b2   :  { %v231_v45 = vsel %vm230_vm6, %v219_v30, %v212_v44 }
 0x1b3   :  { %311 = vmatmul.msk.f32.vlgmr.msra.gmra.mxu2 %vm205_vm5, %v231_v45 }
 0x236   :  { %v251_v49 = vpop.f32.mrf.mxu2 }
 0x237   :  { %v252_v50 = vadd.f32 %v320_v48, %v251_v49 }
 0x239   :  { %v255_v51 = vmul.f32 0.1, %v252_v50  ;;  %vm254_vm7 = vcmp.gt.f32.partialorder %v252_v50, 0.0 }
 0x23b   :  { %v256_v52 = vsel %vm254_vm7, %v252_v50, %v255_v51 }
 0x23c   :  { %312 = vmatmul.msk.f32.vlgmr.msra.gmra.mxu3 %vm205_vm5, %v256_v52 }
 0x2bf   :  { %v285_v54 = vpop.f32.mrf.mxu3 }
 0x2c0   :  { %v286_v55 = vadd.f32 %v321_v53, %v285_v54 }
 0x2c2   :  { %288 = vst [vmem:[#allocation2] sm:$0x3] %v286_v55 }
 0x2c3   :  { %299 = dma.vmem_to_hbm [thread:$0]  %s295_s18, 32, %s297_s20, [#allocation3]  }
 0x2c4   :  { %354 = dma.done.wait [#allocation3], 32  }
 0x2c5   :  { %355 = vsyncadd [#allocation3], 4294967264 }
 0x2c6   :  { %304 = vsyncpa [#allocation3], 1 }

</bundles_post_ra>
